<compile_context>
chip_gen: v6e
topology: v6e:2x2x1
jax: 0.10.0
libtpu: 0.0.40
codegen_flags: <defaults>
</compile_context>

<pallas_src>
import functools

import jax
import jax.numpy as jnp
from jax import lax
from jax.experimental import pallas as pl
from jax.experimental.pallas import tpu as pltpu


# --------------------------------------------------------------------------- #
# Kernel
# --------------------------------------------------------------------------- #
def zformer_kernel(x_ref, wq_ref, bq_ref, wk_ref, bk_ref, wv_ref, bv_ref,
                   wo_ref, bo_ref, mask_ref, o_ref,
                   *, batch_block, seq_len, kv_in_f32):
    f32 = jnp.float32
    bf16 = jnp.bfloat16
    x = x_ref[...]                                     # (rows, D) bf16, batch-major
    rows, D = x.shape
    bb, L = batch_block, seq_len

    # Fused projections over every row of the chunk (bf16 operands, f32 accum).
    # head_dim**-0.5 / scalar is already folded into wq_ref / bq_ref.
    q = jnp.dot(x, wq_ref[...], preferred_element_type=f32) + bq_ref[...]
    k = jnp.dot(x, wk_ref[...], preferred_element_type=f32) + bk_ref[...]
    v = jnp.dot(x, wv_ref[...], preferred_element_type=f32) + bv_ref[...]

    # Batched linear attention: contract over L per batch element with a single
    # batched dot_general (no Python unroll, no concat copy).  The precomputed
    # block-diagonal head mask makes the full-width (D, D) kv equivalent to the
    # per-head K_h^T V_h blocks.
    # TODO(synk): for head_dim >= 128 switch to a head-batched dot_general
    # (batch over (b, h)) to avoid the ~H x MXU overcompute of the masked form.
    k3 = k.astype(bf16).reshape(bb, L, D)
    v3 = v.astype(bf16).reshape(bb, L, D)
    kv = lax.dot_general(k3, v3, (((1,), (1,)), ((0,), (0,))),
                         preferred_element_type=f32)            # (bb, D, D)

    if kv_in_f32:
        kvm = kv * mask_ref[...].astype(f32)
        a3 = lax.dot_general(q.reshape(bb, L, D), kvm,
                             (((2,), (1,)), ((0,), (0,))),
                             preferred_element_type=f32)        # (bb, L, D)
    else:
        kvm = kv.astype(bf16) * mask_ref[...]
        a3 = lax.dot_general(q.astype(bf16).reshape(bb, L, D), kvm,
                             (((2,), (1,)), ((0,), (0,))),
                             preferred_element_type=f32)        # (bb, L, D)
    a = a3.reshape(rows, D)

    # Output projection; the '(b h) l d -> b l (d h)' head merge is already
    # folded into wo_ref (row-permuted in the wrapper).
    out = jnp.dot(a.astype(bf16), wo_ref[...],
                  preferred_element_type=f32) + bo_ref[...]
    o_ref[...] = out.astype(o_ref.dtype)


# --------------------------------------------------------------------------- #
# Per-generation tuning + chunk heuristic
# --------------------------------------------------------------------------- #
def _tpu_generation():
    """Coarse per-generation knobs: TC count, VMEM limit, MXU-filling rows."""
    try:
        kind = jax.devices()[0].device_kind.lower()
    except Exception:
        kind = ""
    if "v7" in kind:
        # Dual TensorCore, 64 MiB VMEM per TC -> leave headroom.
        return dict(num_tc=2, vmem_limit=56 * 1024 * 1024, mxu_rows=256)
    if "v6" in kind:
        return dict(num_tc=1, vmem_limit=100 * 1024 * 1024, mxu_rows=256)
    if "v5" in kind:
        return dict(num_tc=1, vmem_limit=100 * 1024 * 1024, mxu_rows=128)
    # Unknown backend: conservative defaults.
    return dict(num_tc=1, vmem_limit=56 * 1024 * 1024, mxu_rows=256)


def _chunk_vmem_bytes(bb, L, D, single_buffer_consts=True):
    """Rough VMEM footprint of one grid step (bb batch elements fused)."""
    rows = bb * L
    act = rows * D
    x_tiles = 2 * act * 2                    # bf16 input slab, double-buffered
    out_tiles = 2 * act * 4                  # f32 output slab, double-buffered
    temps = 7 * act * 4                      # q/k/v f32 + bf16 copies + attn acc
    kv = bb * D * D * (4 + 2)                # f32 kv + masked bf16 copy
    cbuf = 1 if single_buffer_consts else 2
    consts = cbuf * (4 * D * D * 2 + 4 * D * 4 + D * D * 2)  # weights/biases/mask
    return x_tiles + out_tiles + temps + kv + consts


def _choose_batch_block(B, L, D, info, single_buffer_consts=True):
    """Batch elements fused per grid step (projection matmul height = bb*L)."""
    if L % 8 != 0:
        # Per-batch row blocks would be sublane-misaligned; one full-array
        # chunk (block == full array) is always layout-legal.
        # TODO(synk): pad L to a multiple of 8 instead for very large B*L.
        return B
    budget = int(0.75 * info["vmem_limit"])
    cands = [bb for bb in range(1, B + 1)
             if B % bb == 0
             and _chunk_vmem_bytes(bb, L, D, single_buffer_consts) <= budget]
    if not cands:
        # Nothing fits the budget: take the smallest legal chunk rather than
        # fusing the whole batch (the old VMEM-OOM footgun).
        # TODO(synk): tile over the sequence dimension for very long L.
        return 1
    if info["num_tc"] >= 2:
        # Dual-TC (v7x): prefer >= num_tc chunks as long as every chunk still
        # feeds the MXU with >= mxu_rows rows.
        multi = [bb for bb in cands
                 if B // bb >= info["num_tc"] and bb * L >= info["mxu_rows"]]
        if multi:
            return max(multi)
    # Single-TC chips (or tiny problems): the biggest chunk that fits wins.
    return max(cands)


# --------------------------------------------------------------------------- #
# Wrapper
# --------------------------------------------------------------------------- #
def zformer_forward(x_lbd, params, num_heads, out_dtype=None):
    """x_lbd: (L, B, D) like the PyTorch module.  Returns (L, B, D)."""
    L, B, D = x_lbd.shape
    head_dim = D // num_heads
    assert head_dim * num_heads == D, "input_dim must be divisible by num_heads"
    wq, bq, wk, bk, wv, bv, wo, bo, scalar = params
    out_dtype = x_lbd.dtype if out_dtype is None else out_dtype

    # Fold head_dim**-0.5 and the learned 1/scalar into Wq / bq in f32 (the
    # scale commutes through everything downstream of q).
    scale = jnp.float32(float(head_dim) ** -0.5) / scalar.astype(jnp.float32)
    wq_s = wq.astype(jnp.float32) * scale
    bq_s = bq.astype(jnp.float32) * scale

    # Fold the '(b h) l d -> b l (d h)' head merge into out_proj: merged column
    # j = d*H + h corresponds to column h*hd + d of the head-major output the
    # kernel produces, so wo_perm[h*hd + d] = wo[d*H + h].
    idx = jnp.arange(D)
    perm = (idx % head_dim) * num_heads + idx // head_dim
    wo_perm = wo[perm]

    # Block-diagonal head mask, built once and streamed in as a constant.
    head_id = idx // head_dim
    head_mask = (head_id[:, None] == head_id[None, :]).astype(jnp.bfloat16)

    # Batch-major, lane-dense 2-D activation slab in bf16.
    # TODO(synk): keep activations batch-major across the surrounding model so
    # these two HBM transpose passes disappear.
    x2 = jnp.transpose(x_lbd, (1, 0, 2)).reshape(B * L, D).astype(jnp.bfloat16)
    weights = [w.astype(jnp.bfloat16) for w in (wq_s, wk, wv, wo_perm)]
    biases = [b.reshape(1, D).astype(jnp.float32) for b in (bq_s, bk, bv, bo)]

    info = _tpu_generation()
    bb = _choose_batch_block(B, L, D, info)
    n_chunks = B // bb
    rows = bb * L
    kv_in_f32 = L >= 512   # bf16 kv loses precision once K^T V grows with L

    kernel = functools.partial(zformer_kernel, batch_block=bb, seq_len=L,
                               kv_in_f32=kv_in_f32)

    def call(single_buffer_consts):
        if single_buffer_consts:
            const = lambda shape: pl.BlockSpec(
                shape, lambda c: (0,) * len(shape), pipeline_mode=pl.Buffered(1))
        else:
            const = lambda shape: pl.BlockSpec(shape, lambda c: (0,) * len(shape))
        w_spec, b_spec, m_spec = const((D, D)), const((1, D)), const((D, D))
        return pl.pallas_call(
            kernel,
            out_shape=jax.ShapeDtypeStruct((B * L, D), out_dtype),
            grid_spec=pltpu.PrefetchScalarGridSpec(
                num_scalar_prefetch=0,
                grid=(n_chunks,),
                in_specs=[
                    pl.BlockSpec((rows, D), lambda c: (c, 0)),       # x slab
                    w_spec, b_spec,                                  # Wq (scaled), bq
                    w_spec, b_spec,                                  # Wk, bk
                    w_spec, b_spec,                                  # Wv, bv
                    w_spec, b_spec,                                  # Wo (permuted), bo
                    m_spec,                                          # head mask
                ],
                out_specs=pl.BlockSpec((rows, D), lambda c: (c, 0)),
            ),
            compiler_params=pltpu.CompilerParams(
                dimension_semantics=("parallel",),
                vmem_limit_bytes=info["vmem_limit"],
            ),
        )(x2,
          weights[0], biases[0], weights[1], biases[1],
          weights[2], biases[2], weights[3], biases[3],
          head_mask)

    try:
        # Constant-index operands single-buffered (they never change across the
        # grid, so double-buffering them is pure VMEM waste).
        out2 = call(single_buffer_consts=hasattr(pl, "Buffered"))
    except Exception:
        # pipeline_mode / Buffered(1) not supported on this JAX: plain specs.
        out2 = call(single_buffer_consts=False)

    return jnp.transpose(out2.reshape(B, L, D), (1, 0, 2))              # (L, B, D)


# --------------------------------------------------------------------------- #
# Reference + params (validation only)
# --------------------------------------------------------------------------- #
def zformer_reference(x_lbd, params, num_heads):
    """Plain-JAX f32 transcription of the PyTorch forward (for validation)."""
    L, B, D = x_lbd.shape
    hd = D // num_heads
    wq, bq, wk, bk, wv, bv, wo, bo, scalar = params

    X = jnp.transpose(x_lbd, (1, 0, 2))                                 # b l d
    q = X @ wq + bq
    k = X @ wk + bk
    v = X @ wv + bv
    q = q * (float(hd) ** -0.5)

    def split(t):  # 'b l (h d) -> (b h) l d'
        return t.reshape(B, L, num_heads, hd).transpose(0, 2, 1, 3).reshape(B * num_heads, L, hd)

    q, k, v = split(q), split(k), split(v)
    kt = jnp.transpose(k, (0, 2, 1))                                    # 'b l d -> b d l'
    Xh = kt @ v
    Xh = q @ Xh / scalar
    # '(b h) l d -> b l (d h)'
    Y = Xh.reshape(B, num_heads, L, hd).transpose(0, 2, 3, 1).reshape(B, L, hd * num_heads)
    out = Y @ wo + bo
    return jnp.transpose(out, (1, 0, 2))                                # l b d


def init_params(key, D, scalar=700.0):
    ks = jax.random.split(key, 8)
    bound = (6.0 / (D + D)) ** 0.5   # xavier_uniform for square (in, out) weight
    bbound = (1.0 / D) ** 0.5        # nn.Linear-style bias init
    wq = jax.random.uniform(ks[0], (D, D), jnp.float32, -bound, bound)
    wk = jax.random.uniform(ks[1], (D, D), jnp.float32, -bound, bound)
    wv = jax.random.uniform(ks[2], (D, D), jnp.float32, -bound, bound)
    wo = jax.random.uniform(ks[3], (D, D), jnp.float32, -bound, bound)
    bq = jax.random.uniform(ks[4], (D,), jnp.float32, -bbound, bbound)
    bk = jax.random.uniform(ks[5], (D,), jnp.float32, -bbound, bbound)
    bv = jax.random.uniform(ks[6], (D,), jnp.float32, -bbound, bbound)
    bo = jax.random.uniform(ks[7], (D,), jnp.float32, -bbound, bbound)
    return (wq, bq, wk, bk, wv, bv, wo, bo, jnp.float32(scalar))


if __name__ == "__main__":
    L, B, D, H = 16, 2, 32, 4   # seq, batch, hidden, heads (head_dim = 8)

    key = jax.random.PRNGKey(0)
    kx, kp = jax.random.split(key)
    x = jax.random.normal(kx, (L, B, D), jnp.float32)
    params = init_params(kp, D)

    out = jax.block_until_ready(zformer_forward(x, params, num_heads=H))

    ref = zformer_reference(x, params, num_heads=H)
    assert out.shape == (L, B, D)
    # bf16 MXU operands with f32 accumulation -> loosened tolerance vs f32 ref.
    assert jnp.allclose(out, ref, rtol=2e-2, atol=2e-2), "mismatch vs reference"
    print("KERNEL_OK")
</pallas_src>

<mosaic_0001>
module attributes {stable_mosaic.version = 11 : i64} {
  func.func @zformer_kernel(%arg0: i32, %arg1: memref<32x32xbf16, #tpu.memory_space<vmem>>, %arg2: memref<32x32xbf16, #tpu.memory_space<vmem>>, %arg3: memref<1x32xf32, #tpu.memory_space<vmem>>, %arg4: memref<32x32xbf16, #tpu.memory_space<vmem>>, %arg5: memref<1x32xf32, #tpu.memory_space<vmem>>, %arg6: memref<32x32xbf16, #tpu.memory_space<vmem>>, %arg7: memref<1x32xf32, #tpu.memory_space<vmem>>, %arg8: memref<32x32xbf16, #tpu.memory_space<vmem>>, %arg9: memref<1x32xf32, #tpu.memory_space<vmem>>, %arg10: memref<32x32xbf16, #tpu.memory_space<vmem>>, %arg11: memref<32x32xf32, #tpu.memory_space<vmem>>) attributes {dimension_semantics = [#tpu.dimension_semantics<parallel>], iteration_bounds = array<i64: 1>, scalar_prefetch = 0 : i64, scratch_operands = 0 : i64, tpu.core_type = #tpu.core_type<tc>, window_params = [{transform_indices = @transform_0, window_bounds = array<i64: 32, 32>}, {pipeline_mode = #tpu.pipeline_mode<synchronous>, transform_indices = @transform_1, window_bounds = array<i64: 32, 32>}, {pipeline_mode = #tpu.pipeline_mode<synchronous>, transform_indices = @transform_2, window_bounds = array<i64: 1, 32>}, {pipeline_mode = #tpu.pipeline_mode<synchronous>, transform_indices = @transform_3, window_bounds = array<i64: 32, 32>}, {pipeline_mode = #tpu.pipeline_mode<synchronous>, transform_indices = @transform_4, window_bounds = array<i64: 1, 32>}, {pipeline_mode = #tpu.pipeline_mode<synchronous>, transform_indices = @transform_5, window_bounds = array<i64: 32, 32>}, {pipeline_mode = #tpu.pipeline_mode<synchronous>, transform_indices = @transform_6, window_bounds = array<i64: 1, 32>}, {pipeline_mode = #tpu.pipeline_mode<synchronous>, transform_indices = @transform_7, window_bounds = array<i64: 32, 32>}, {pipeline_mode = #tpu.pipeline_mode<synchronous>, transform_indices = @transform_8, window_bounds = array<i64: 1, 32>}, {pipeline_mode = #tpu.pipeline_mode<synchronous>, transform_indices = @transform_9, window_bounds = array<i64: 32, 32>}, {transform_indices = @transform_10, window_bounds = array<i64: 32, 32>}]} {
    %c0 = arith.constant 0 : index
    %c0_0 = arith.constant 0 : index
    %0 = vector.load %arg1[%c0, %c0_0] : memref<32x32xbf16, #tpu.memory_space<vmem>>, vector<32x32xbf16>
    %c0_1 = arith.constant 0 : index
    %c0_2 = arith.constant 0 : index
    %1 = vector.load %arg2[%c0_1, %c0_2] : memref<32x32xbf16, #tpu.memory_space<vmem>>, vector<32x32xbf16>
    %cst = arith.constant dense<0.000000e+00> : vector<32x32xf32>
    %2 = tpu.matmul %0, %1, %cst {dimension_numbers = #tpu.dot_dimension_numbers<[1], [0], [0], [1], [0, 0, 1, 1], [], []>} : vector<32x32xbf16>, vector<32x32xbf16>, vector<32x32xf32> -> vector<32x32xf32>
    %c0_3 = arith.constant 0 : index
    %c0_4 = arith.constant 0 : index
    %3 = vector.load %arg3[%c0_3, %c0_4] : memref<1x32xf32, #tpu.memory_space<vmem>>, vector<1x32xf32>
    %4 = vector.broadcast %3 : vector<1x32xf32> to vector<32x32xf32>
    %5 = arith.addf %2, %4 : vector<32x32xf32>
    %c0_5 = arith.constant 0 : index
    %c0_6 = arith.constant 0 : index
    %6 = vector.load %arg4[%c0_5, %c0_6] : memref<32x32xbf16, #tpu.memory_space<vmem>>, vector<32x32xbf16>
    %cst_7 = arith.constant dense<0.000000e+00> : vector<32x32xf32>
    %7 = tpu.matmul %0, %6, %cst_7 {dimension_numbers = #tpu.dot_dimension_numbers<[1], [0], [0], [1], [0, 0, 1, 1], [], []>} : vector<32x32xbf16>, vector<32x32xbf16>, vector<32x32xf32> -> vector<32x32xf32>
    %c0_8 = arith.constant 0 : index
    %c0_9 = arith.constant 0 : index
    %8 = vector.load %arg5[%c0_8, %c0_9] : memref<1x32xf32, #tpu.memory_space<vmem>>, vector<1x32xf32>
    %9 = vector.broadcast %8 : vector<1x32xf32> to vector<32x32xf32>
    %10 = arith.addf %7, %9 : vector<32x32xf32>
    %c0_10 = arith.constant 0 : index
    %c0_11 = arith.constant 0 : index
    %11 = vector.load %arg6[%c0_10, %c0_11] : memref<32x32xbf16, #tpu.memory_space<vmem>>, vector<32x32xbf16>
    %cst_12 = arith.constant dense<0.000000e+00> : vector<32x32xf32>
    %12 = tpu.matmul %0, %11, %cst_12 {dimension_numbers = #tpu.dot_dimension_numbers<[1], [0], [0], [1], [0, 0, 1, 1], [], []>} : vector<32x32xbf16>, vector<32x32xbf16>, vector<32x32xf32> -> vector<32x32xf32>
    %c0_13 = arith.constant 0 : index
    %c0_14 = arith.constant 0 : index
    %13 = vector.load %arg7[%c0_13, %c0_14] : memref<1x32xf32, #tpu.memory_space<vmem>>, vector<1x32xf32>
    %14 = vector.broadcast %13 : vector<1x32xf32> to vector<32x32xf32>
    %15 = arith.addf %12, %14 : vector<32x32xf32>
    %16 = arith.truncf %10 : vector<32x32xf32> to vector<32x32xbf16>
    %17 = vector.shape_cast %16 : vector<32x32xbf16> to vector<2x16x32xbf16>
    %18 = arith.truncf %15 : vector<32x32xf32> to vector<32x32xbf16>
    %19 = vector.shape_cast %18 : vector<32x32xbf16> to vector<2x16x32xbf16>
    %cst_15 = arith.constant dense<0.000000e+00> : vector<2x32x32xf32>
    %20 = tpu.matmul %17, %19, %cst_15 {dimension_numbers = #tpu.dot_dimension_numbers<[1], [1], [2], [2], [0, 0, 0, 2, 1, 2], [0], [0]>} : vector<2x16x32xbf16>, vector<2x16x32xbf16>, vector<2x32x32xf32> -> vector<2x32x32xf32>
    %21 = arith.truncf %20 : vector<2x32x32xf32> to vector<2x32x32xbf16>
    %c0_16 = arith.constant 0 : index
    %c0_17 = arith.constant 0 : index
    %22 = vector.load %arg10[%c0_16, %c0_17] : memref<32x32xbf16, #tpu.memory_space<vmem>>, vector<32x32xbf16>
    %23 = vector.shape_cast %22 : vector<32x32xbf16> to vector<1x32x32xbf16>
    %24 = vector.broadcast %23 : vector<1x32x32xbf16> to vector<2x32x32xbf16>
    %25 = arith.mulf %21, %24 : vector<2x32x32xbf16>
    %26 = arith.truncf %5 : vector<32x32xf32> to vector<32x32xbf16>
    %27 = vector.shape_cast %26 : vector<32x32xbf16> to vector<2x16x32xbf16>
    %cst_18 = arith.constant dense<0.000000e+00> : vector<2x16x32xf32>
    %28 = tpu.matmul %27, %25, %cst_18 {dimension_numbers = #tpu.dot_dimension_numbers<[2], [1], [1], [2], [0, 0, 0, 1, 1, 2], [0], [0]>} : vector<2x16x32xbf16>, vector<2x32x32xbf16>, vector<2x16x32xf32> -> vector<2x16x32xf32>
    %29 = vector.shape_cast %28 : vector<2x16x32xf32> to vector<32x32xf32>
    %30 = arith.truncf %29 : vector<32x32xf32> to vector<32x32xbf16>
    %c0_19 = arith.constant 0 : index
    %c0_20 = arith.constant 0 : index
    %31 = vector.load %arg8[%c0_19, %c0_20] : memref<32x32xbf16, #tpu.memory_space<vmem>>, vector<32x32xbf16>
    %cst_21 = arith.constant dense<0.000000e+00> : vector<32x32xf32>
    %32 = tpu.matmul %30, %31, %cst_21 {dimension_numbers = #tpu.dot_dimension_numbers<[1], [0], [0], [1], [0, 0, 1, 1], [], []>} : vector<32x32xbf16>, vector<32x32xbf16>, vector<32x32xf32> -> vector<32x32xf32>
    %c0_22 = arith.constant 0 : index
    %c0_23 = arith.constant 0 : index
    %33 = vector.load %arg9[%c0_22, %c0_23] : memref<1x32xf32, #tpu.memory_space<vmem>>, vector<1x32xf32>
    %34 = vector.broadcast %33 : vector<1x32xf32> to vector<32x32xf32>
    %35 = arith.addf %32, %34 : vector<32x32xf32>
    %c0_24 = arith.constant 0 : index
    %c0_25 = arith.constant 0 : index
    %36 = vector.load %arg11[%c0_24, %c0_25] : memref<32x32xf32, #tpu.memory_space<vmem>>, vector<32x32xf32>
    tpu.vector_store %arg11[%c0_24, %c0_25], %35 {strides = array<i32>} : memref<32x32xf32, #tpu.memory_space<vmem>>, vector<32x32xf32>,
    return
  }
  func.func @transform_0(%arg0: i32) -> (i32, i32) {
    %c0_i32 = arith.constant 0 : i32
    %c0_i32_0 = arith.constant 0 : i32
    return %arg0, %c0_i32 : i32, i32
  }
  func.func @transform_1(%arg0: i32) -> (i32, i32) {
    %c0_i32 = arith.constant 0 : i32
    %c0_i32_0 = arith.constant 0 : i32
    %c0_i32_1 = arith.constant 0 : i32
    return %c0_i32, %c0_i32_0 : i32, i32
  }
  func.func @transform_2(%arg0: i32) -> (i32, i32) {
    %c0_i32 = arith.constant 0 : i32
    %c0_i32_0 = arith.constant 0 : i32
    %c0_i32_1 = arith.constant 0 : i32
    return %c0_i32, %c0_i32_0 : i32, i32
  }
  func.func @transform_3(%arg0: i32) -> (i32, i32) {
    %c0_i32 = arith.constant 0 : i32
    %c0_i32_0 = arith.constant 0 : i32
    %c0_i32_1 = arith.constant 0 : i32
    return %c0_i32, %c0_i32_0 : i32, i32
  }
  func.func @transform_4(%arg0: i32) -> (i32, i32) {
    %c0_i32 = arith.constant 0 : i32
    %c0_i32_0 = arith.constant 0 : i32
    %c0_i32_1 = arith.constant 0 : i32
    return %c0_i32, %c0_i32_0 : i32, i32
  }
  func.func @transform_5(%arg0: i32) -> (i32, i32) {
    %c0_i32 = arith.constant 0 : i32
    %c0_i32_0 = arith.constant 0 : i32
    %c0_i32_1 = arith.constant 0 : i32
    return %c0_i32, %c0_i32_0 : i32, i32
  }
  func.func @transform_6(%arg0: i32) -> (i32, i32) {
    %c0_i32 = arith.constant 0 : i32
    %c0_i32_0 = arith.constant 0 : i32
    %c0_i32_1 = arith.constant 0 : i32
    return %c0_i32, %c0_i32_0 : i32, i32
  }
  func.func @transform_7(%arg0: i32) -> (i32, i32) {
    %c0_i32 = arith.constant 0 : i32
    %c0_i32_0 = arith.constant 0 : i32
    %c0_i32_1 = arith.constant 0 : i32
    return %c0_i32, %c0_i32_0 : i32, i32
  }
  func.func @transform_8(%arg0: i32) -> (i32, i32) {
    %c0_i32 = arith.constant 0 : i32
    %c0_i32_0 = arith.constant 0 : i32
    %c0_i32_1 = arith.constant 0 : i32
    return %c0_i32, %c0_i32_0 : i32, i32
  }
  func.func @transform_9(%arg0: i32) -> (i32, i32) {
    %c0_i32 = arith.constant 0 : i32
    %c0_i32_0 = arith.constant 0 : i32
    %c0_i32_1 = arith.constant 0 : i32
    return %c0_i32, %c0_i32_0 : i32, i32
  }
  func.func @transform_10(%arg0: i32) -> (i32, i32) {
    %c0_i32 = arith.constant 0 : i32
    %c0_i32_0 = arith.constant 0 : i32
    return %arg0, %c0_i32 : i32, i32
  }
}

module attributes {stable_mosaic.version = 11 : i64} {
  func.func @zformer_kernel(%arg0: i32, %arg1: memref<32x32xbf16, #tpu.memory_space<vmem>>, %arg2: memref<32x32xbf16, #tpu.memory_space<vmem>>, %arg3: memref<1x32xf32, #tpu.memory_space<vmem>>, %arg4: memref<32x32xbf16, #tpu.memory_space<vmem>>, %arg5: memref<1x32xf32, #tpu.memory_space<vmem>>, %arg6: memref<32x32xbf16, #tpu.memory_space<vmem>>, %arg7: memref<1x32xf32, #tpu.memory_space<vmem>>, %arg8: memref<32x32xbf16, #tpu.memory_space<vmem>>, %arg9: memref<1x32xf32, #tpu.memory_space<vmem>>, %arg10: memref<32x32xbf16, #tpu.memory_space<vmem>>, %arg11: memref<32x32xf32, #tpu.memory_space<vmem>>) attributes {dimension_semantics = [#tpu.dimension_semantics<parallel>], iteration_bounds = array<i64: 1>, scalar_prefetch = 0 : i64, scratch_operands = 0 : i64, tpu.core_type = #tpu.core_type<tc>, window_params = [{transform_indices = @transform_0, window_bounds = array<i64: 32, 32>}, {pipeline_mode = #tpu.pipeline_mode<synchronous>, transform_indices = @transform_1, window_bounds = array<i64: 32, 32>}, {pipeline_mode = #tpu.pipeline_mode<synchronous>, transform_indices = @transform_2, window_bounds = array<i64: 1, 32>}, {pipeline_mode = #tpu.pipeline_mode<synchronous>, transform_indices = @transform_3, window_bounds = array<i64: 32, 32>}, {pipeline_mode = #tpu.pipeline_mode<synchronous>, transform_indices = @transform_4, window_bounds = array<i64: 1, 32>}, {pipeline_mode = #tpu.pipeline_mode<synchronous>, transform_indices = @transform_5, window_bounds = array<i64: 32, 32>}, {pipeline_mode = #tpu.pipeline_mode<synchronous>, transform_indices = @transform_6, window_bounds = array<i64: 1, 32>}, {pipeline_mode = #tpu.pipeline_mode<synchronous>, transform_indices = @transform_7, window_bounds = array<i64: 32, 32>}, {pipeline_mode = #tpu.pipeline_mode<synchronous>, transform_indices = @transform_8, window_bounds = array<i64: 1, 32>}, {pipeline_mode = #tpu.pipeline_mode<synchronous>, transform_indices = @transform_9, window_bounds = array<i64: 32, 32>}, {transform_indices = @transform_10, window_bounds = array<i64: 32, 32>}]} {
    %c0 = arith.constant 0 : index
    %c0_0 = arith.constant 0 : index
    %0 = vector.load %arg1[%c0, %c0_0] : memref<32x32xbf16, #tpu.memory_space<vmem>>, vector<32x32xbf16>
    %c0_1 = arith.constant 0 : index
    %c0_2 = arith.constant 0 : index
    %1 = vector.load %arg2[%c0_1, %c0_2] : memref<32x32xbf16, #tpu.memory_space<vmem>>, vector<32x32xbf16>
    %cst = arith.constant dense<0.000000e+00> : vector<32x32xf32>
    %2 = tpu.matmul %0, %1, %cst {dimension_numbers = #tpu.dot_dimension_numbers<[1], [0], [0], [1], [0, 0, 1, 1], [], []>} : vector<32x32xbf16>, vector<32x32xbf16>, vector<32x32xf32> -> vector<32x32xf32>
    %c0_3 = arith.constant 0 : index
    %c0_4 = arith.constant 0 : index
    %3 = vector.load %arg3[%c0_3, %c0_4] : memref<1x32xf32, #tpu.memory_space<vmem>>, vector<1x32xf32>
    %4 = vector.broadcast %3 : vector<1x32xf32> to vector<32x32xf32>
    %5 = arith.addf %2, %4 : vector<32x32xf32>
    %c0_5 = arith.constant 0 : index
    %c0_6 = arith.constant 0 : index
    %6 = vector.load %arg4[%c0_5, %c0_6] : memref<32x32xbf16, #tpu.memory_space<vmem>>, vector<32x32xbf16>
    %cst_7 = arith.constant dense<0.000000e+00> : vector<32x32xf32>
    %7 = tpu.matmul %0, %6, %cst_7 {dimension_numbers = #tpu.dot_dimension_numbers<[1], [0], [0], [1], [0, 0, 1, 1], [], []>} : vector<32x32xbf16>, vector<32x32xbf16>, vector<32x32xf32> -> vector<32x32xf32>
    %c0_8 = arith.constant 0 : index
    %c0_9 = arith.constant 0 : index
    %8 = vector.load %arg5[%c0_8, %c0_9] : memref<1x32xf32, #tpu.memory_space<vmem>>, vector<1x32xf32>
    %9 = vector.broadcast %8 : vector<1x32xf32> to vector<32x32xf32>
    %10 = arith.addf %7, %9 : vector<32x32xf32>
    %c0_10 = arith.constant 0 : index
    %c0_11 = arith.constant 0 : index
    %11 = vector.load %arg6[%c0_10, %c0_11] : memref<32x32xbf16, #tpu.memory_space<vmem>>, vector<32x32xbf16>
    %cst_12 = arith.constant dense<0.000000e+00> : vector<32x32xf32>
    %12 = tpu.matmul %0, %11, %cst_12 {dimension_numbers = #tpu.dot_dimension_numbers<[1], [0], [0], [1], [0, 0, 1, 1], [], []>} : vector<32x32xbf16>, vector<32x32xbf16>, vector<32x32xf32> -> vector<32x32xf32>
    %c0_13 = arith.constant 0 : index
    %c0_14 = arith.constant 0 : index
    %13 = vector.load %arg7[%c0_13, %c0_14] : memref<1x32xf32, #tpu.memory_space<vmem>>, vector<1x32xf32>
    %14 = vector.broadcast %13 : vector<1x32xf32> to vector<32x32xf32>
    %15 = arith.addf %12, %14 : vector<32x32xf32>
    %16 = arith.truncf %10 : vector<32x32xf32> to vector<32x32xbf16>
    %17 = vector.shape_cast %16 : vector<32x32xbf16> to vector<2x16x32xbf16>
    %18 = arith.truncf %15 : vector<32x32xf32> to vector<32x32xbf16>
    %19 = vector.shape_cast %18 : vector<32x32xbf16> to vector<2x16x32xbf16>
    %cst_15 = arith.constant dense<0.000000e+00> : vector<2x32x32xf32>
    %20 = tpu.matmul %17, %19, %cst_15 {dimension_numbers = #tpu.dot_dimension_numbers<[1], [1], [2], [2], [0, 0, 0, 2, 1, 2], [0], [0]>} : vector<2x16x32xbf16>, vector<2x16x32xbf16>, vector<2x32x32xf32> -> vector<2x32x32xf32>
    %21 = arith.truncf %20 : vector<2x32x32xf32> to vector<2x32x32xbf16>
    %c0_16 = arith.constant 0 : index
    %c0_17 = arith.constant 0 : index
    %22 = vector.load %arg10[%c0_16, %c0_17] : memref<32x32xbf16, #tpu.memory_space<vmem>>, vector<32x32xbf16>
    %23 = vector.shape_cast %22 : vector<32x32xbf16> to vector<1x32x32xbf16>
    %24 = vector.broadcast %23 : vector<1x32x32xbf16> to vector<2x32x32xbf16>
    %25 = arith.mulf %21, %24 : vector<2x32x32xbf16>
    %26 = arith.truncf %5 : vector<32x32xf32> to vector<32x32xbf16>
    %27 = vector.shape_cast %26 : vector<32x32xbf16> to vector<2x16x32xbf16>
    %cst_18 = arith.constant dense<0.000000e+00> : vector<2x16x32xf32>
    %28 = tpu.matmul %27, %25, %cst_18 {dimension_numbers = #tpu.dot_dimension_numbers<[2], [1], [1], [2], [0, 0, 0, 1, 1, 2], [0], [0]>} : vector<2x16x32xbf16>, vector<2x32x32xbf16>, vector<2x16x32xf32> -> vector<2x16x32xf32>
    %29 = vector.shape_cast %28 : vector<2x16x32xf32> to vector<32x32xf32>
    %30 = arith.truncf %29 : vector<32x32xf32> to vector<32x32xbf16>
    %c0_19 = arith.constant 0 : index
    %c0_20 = arith.constant 0 : index
    %31 = vector.load %arg8[%c0_19, %c0_20] : memref<32x32xbf16, #tpu.memory_space<vmem>>, vector<32x32xbf16>
    %cst_21 = arith.constant dense<0.000000e+00> : vector<32x32xf32>
    %32 = tpu.matmul %30, %31, %cst_21 {dimension_numbers = #tpu.dot_dimension_numbers<[1], [0], [0], [1], [0, 0, 1, 1], [], []>} : vector<32x32xbf16>, vector<32x32xbf16>, vector<32x32xf32> -> vector<32x32xf32>
    %c0_22 = arith.constant 0 : index
    %c0_23 = arith.constant 0 : index
    %33 = vector.load %arg9[%c0_22, %c0_23] : memref<1x32xf32, #tpu.memory_space<vmem>>, vector<1x32xf32>
    %34 = vector.broadcast %33 : vector<1x32xf32> to vector<32x32xf32>
    %35 = arith.addf %32, %34 : vector<32x32xf32>
    %c0_24 = arith.constant 0 : index
    %c0_25 = arith.constant 0 : index
    %36 = vector.load %arg11[%c0_24, %c0_25] : memref<32x32xf32, #tpu.memory_space<vmem>>, vector<32x32xf32>
    tpu.vector_store %arg11[%c0_24, %c0_25], %35 {strides = array<i32>} : memref<32x32xf32, #tpu.memory_space<vmem>>, vector<32x32xf32>,
    return
  }
  func.func @transform_0(%arg0: i32) -> (i32, i32) {
    %c0_i32 = arith.constant 0 : i32
    %c0_i32_0 = arith.constant 0 : i32
    return %arg0, %c0_i32 : i32, i32
  }
  func.func @transform_1(%arg0: i32) -> (i32, i32) {
    %c0_i32 = arith.constant 0 : i32
    %c0_i32_0 = arith.constant 0 : i32
    %c0_i32_1 = arith.constant 0 : i32
    return %c0_i32, %c0_i32_0 : i32, i32
  }
  func.func @transform_2(%arg0: i32) -> (i32, i32) {
    %c0_i32 = arith.constant 0 : i32
    %c0_i32_0 = arith.constant 0 : i32
    %c0_i32_1 = arith.constant 0 : i32
    return %c0_i32, %c0_i32_0 : i32, i32
  }
  func.func @transform_3(%arg0: i32) -> (i32, i32) {
    %c0_i32 = arith.constant 0 : i32
    %c0_i32_0 = arith.constant 0 : i32
    %c0_i32_1 = arith.constant 0 : i32
    return %c0_i32, %c0_i32_0 : i32, i32
  }
  func.func @transform_4(%arg0: i32) -> (i32, i32) {
    %c0_i32 = arith.constant 0 : i32
    %c0_i32_0 = arith.constant 0 : i32
    %c0_i32_1 = arith.constant 0 : i32
    return %c0_i32, %c0_i32_0 : i32, i32
  }
  func.func @transform_5(%arg0: i32) -> (i32, i32) {
    %c0_i32 = arith.constant 0 : i32
    %c0_i32_0 = arith.constant 0 : i32
    %c0_i32_1 = arith.constant 0 : i32
    return %c0_i32, %c0_i32_0 : i32, i32
  }
  func.func @transform_6(%arg0: i32) -> (i32, i32) {
    %c0_i32 = arith.constant 0 : i32
    %c0_i32_0 = arith.constant 0 : i32
    %c0_i32_1 = arith.constant 0 : i32
    return %c0_i32, %c0_i32_0 : i32, i32
  }
  func.func @transform_7(%arg0: i32) -> (i32, i32) {
    %c0_i32 = arith.constant 0 : i32
    %c0_i32_0 = arith.constant 0 : i32
    %c0_i32_1 = arith.constant 0 : i32
    return %c0_i32, %c0_i32_0 : i32, i32
  }
  func.func @transform_8(%arg0: i32) -> (i32, i32) {
    %c0_i32 = arith.constant 0 : i32
    %c0_i32_0 = arith.constant 0 : i32
    %c0_i32_1 = arith.constant 0 : i32
    return %c0_i32, %c0_i32_0 : i32, i32
  }
  func.func @transform_9(%arg0: i32) -> (i32, i32) {
    %c0_i32 = arith.constant 0 : i32
    %c0_i32_0 = arith.constant 0 : i32
    %c0_i32_1 = arith.constant 0 : i32
    return %c0_i32, %c0_i32_0 : i32, i32
  }
  func.func @transform_10(%arg0: i32) -> (i32, i32) {
    %c0_i32 = arith.constant 0 : i32
    %c0_i32_0 = arith.constant 0 : i32
    return %arg0, %c0_i32 : i32, i32
  }
}

</mosaic_0001>

<bundles_post_ra>
// kernel: tpu_custom_call.1
= control target key start
LH: loop header
LB: loop body
LE: loop exit
PB: predicated region body
PF: predicated region fallthrough
CT: control target
= control target key end

     0   :  { %15 = vsyncpa [#allocation3], 0  ;;  %s1255_s0 = inlined_call_operand.hbm [shape: bf16[32,32], index: 0, kind: input, shape index: {}]   ;;  %s1256_s1 = inlined_call_operand.hbm [shape: bf16[32,32], index: 1, kind: input, shape index: {}]   ;;  %s1257_s2 = inlined_call_operand.hbm [shape: f32[1,32], index: 2, kind: input, shape index: {}]   ;;  %s1258_s3 = inlined_call_operand.hbm [shape: bf16[32,32], index: 3, kind: input, shape index: {}]   ;;  %s1259_s4 = inlined_call_operand.hbm [shape: f32[1,32], index: 4, kind: input, shape index: {}]   ;;  %s1260_s5 = inlined_call_operand.hbm [shape: bf16[32,32], index: 5, kind: input, shape index: {}]   ;;  %s1261_s6 = inlined_call_operand.hbm [shape: f32[1,32], index: 6, kind: input, shape index: {}]   ;;  %s1262_s7 = inlined_call_operand.hbm [shape: bf16[32,32], index: 7, kind: input, shape index: {}]   ;;  %s1263_s8 = inlined_call_operand.hbm [shape: f32[1,32], index: 8, kind: input, shape index: {}]   ;;  %s1264_s9 = inlined_call_operand.vmem [shape: bf16[32,32], index: 9, kind: input, shape index: {}]   ;;  %s1265_s10 = inlined_call_operand.hbm [shape: f32[32,32], index: 10, kind: output, shape index: {}]  }
   0x1   :  { %16 = vsyncpa [#allocation6], 0 }
   0x2   :  { %17 = vsyncpa [#allocation9], 0 }
   0x3   :  { %18 = vsyncpa [#allocation12], 0 }
   0x4   :  { %19 = vsyncpa [#allocation15], 0 }
   0x5   :  { %20 = vsyncpa [#allocation4], 0  ;;  %s1113_s13 = smov [#allocation5]   ;;  %s1114_s15 = smov [#allocation8]  }
   0x6   :  { %s38_s14 = sshll.u32 %s1113_s13, 4  ;;  %s60_s16 = sshll.u32 %s1114_s15, 4  ;;  %s39_s14 = int_to_ptr.vmem [resolvable:$true] %s38_s14  ;;  %s61_s16 = int_to_ptr.vmem [resolvable:$true] %s60_s16 }
   0x7   :  { %s909_s17 = scalar_lea.vmem %s39_s14, 256  ;;  %p914_p1 = scmp.lt.s32.totalorder %s39_s14, %s39_s14 }
   0x8   :  { %p910_p0 = scmp.ne.s32.totalorder %s39_s14, %s909_s17  ;;  %p915_p2 = scmp.lt.s32.totalorder %s909_s17, %s909_s17 }
   0xa   :  { %p916_p3 = por %p915_p2, %p914_p1 }
   0xc   :  { %p917_p4 = pnand %p916_p3, %p910_p0 }
   0xe   :  { %920 = shalt.err (!%p917_p4)
}
   0xf   :  { %s1115_s18 = smov 64   ;;  %s1116_s19 = smov 4  }
  0x10   :  { %44 = dma.hbm_to_vmem [thread:$0]  %s1256_s1, 256, %s39_s14, [#allocation6], %s1115_s18, %s1115_s18, %s1116_s19  }
  0x11   :  { %s929_s22 = scalar_lea.vmem %s61_s16, 256  ;;  %p934_p6 = scmp.lt.s32.totalorder %s61_s16, %s61_s16 }
  0x12   :  { %p930_p5 = scmp.ne.s32.totalorder %s61_s16, %s929_s22  ;;  %p935_p7 = scmp.lt.s32.totalorder %s929_s22, %s929_s22 }
  0x14   :  { %p936_p8 = por %p935_p7, %p934_p6 }
  0x16   :  { %p937_p9 = pnand %p936_p8, %p930_p5 }
  0x18   :  { %940 = shalt.err (!%p937_p9)
}
  0x19   :  { %66 = dma.hbm_to_vmem [thread:$0]  %s1258_s3, 256, %s61_s16, [#allocation9], %s1115_s18, %s1115_s18, %s1116_s19  }
  0x1a   :  { %s1117_s25 = smov [#allocation11]   ;;  %s1118_s27 = smov [#allocation14]  }
  0x1b   :  { %s82_s26 = sshll.u32 %s1117_s25, 4  ;;  %s104_s28 = sshll.u32 %s1118_s27, 4  ;;  %s83_s26 = int_to_ptr.vmem [resolvable:$true] %s82_s26  ;;  %s105_s28 = int_to_ptr.vmem [resolvable:$true] %s104_s28 }
  0x1c   :  { %s949_s1 = scalar_lea.vmem %s83_s26, 256  ;;  %p954_p11 = scmp.lt.s32.totalorder %s83_s26, %s83_s26 }
  0x1d   :  { %p950_p10 = scmp.ne.s32.totalorder %s83_s26, %s949_s1  ;;  %p955_p12 = scmp.lt.s32.totalorder %s949_s1, %s949_s1 }
  0x1f   :  { %p956_p13 = por %p955_p12, %p954_p11 }
  0x21   :  { %p957_p0 = pnand %p956_p13, %p950_p10 }
  0x23   :  { %960 = shalt.err (!%p957_p0)
}
  0x24   :  { %88 = dma.hbm_to_vmem [thread:$0]  %s1260_s5, 256, %s83_s26, [#allocation12], %s1115_s18, %s1115_s18, %s1116_s19  }
  0x25   :  { %s969_s3 = scalar_lea.vmem %s105_s28, 256  ;;  %p974_p2 = scmp.lt.s32.totalorder %s105_s28, %s105_s28 }
  0x26   :  { %p970_p1 = scmp.ne.s32.totalorder %s105_s28, %s969_s3  ;;  %p975_p3 = scmp.lt.s32.totalorder %s969_s3, %s969_s3 }
  0x28   :  { %p976_p4 = por %p975_p3, %p974_p2 }
  0x2a   :  { %p977_p5 = pnand %p976_p4, %p970_p1 }
  0x2c   :  { %980 = shalt.err (!%p977_p5)
}
  0x2d   :  { %110 = dma.hbm_to_vmem [thread:$0]  %s1262_s7, 256, %s105_s28, [#allocation15], %s1115_s18, %s1115_s18, %s1116_s19  }
  0x2e   :  { %s1119_s13 = smov [#allocation2]   ;;  %s1120_s15 = smov [#allocation7]  }
  0x2f   :  { %s26_s14 = sshll.u32 %s1119_s13, 4  ;;  %s51_s16 = sshll.u32 %s1120_s15, 4  ;;  %s27_s14 = int_to_ptr.vmem [resolvable:$true] %s26_s14  ;;  %s52_s16 = int_to_ptr.vmem [resolvable:$true] %s51_s16 }
  0x30   :  { %s989_s5 = scalar_lea.vmem %s27_s14, 256  ;;  %p994_p7 = scmp.lt.s32.totalorder %s27_s14, %s27_s14 }
  0x31   :  { %p990_p6 = scmp.ne.s32.totalorder %s27_s14, %s989_s5  ;;  %p995_p8 = scmp.lt.s32.totalorder %s989_s5, %s989_s5 }
  0x33   :  { %p996_p9 = por %p995_p8, %p994_p7 }
  0x35   :  { %p997_p10 = pnand %p996_p9, %p990_p6 }
  0x37   :  { %1000 = shalt.err (!%p997_p10)
}
  0x38   :  { %32 = dma.hbm_to_vmem [thread:$0]  %s1255_s0, 256, %s27_s14, [#allocation3], %s1115_s18, %s1115_s18, %s1116_s19  }
  0x39   :  { %s1009_s7 = scalar_lea.vmem %s52_s16, 16  ;;  %s1013_s21 = scalar_lea.vmem %s52_s16, 32 }
  0x3a   :  { %p1010_p11 = scmp.ne.s32.totalorder %s52_s16, %s1009_s7  ;;  %p1014_p12 = scmp.lt.s32.totalorder %s52_s16, %s52_s16 }
  0x3b   :  { %p1015_p13 = scmp.lt.s32.totalorder %s1013_s21, %s1009_s7 }
  0x3d   :  { %p1016_p0 = por %p1015_p13, %p1014_p12 }
  0x3f   :  { %p1017_p1 = pnand %p1016_p0, %p1010_p11 }
  0x41   :  { %1020 = shalt.err (!%p1017_p1)
}
  0x42   :  { %54 = dma.hbm_to_vmem [thread:$0]  %s1257_s2, 16, %s52_s16, [#allocation6]  }
  0x43   :  { %s1121_s24 = smov [#allocation10]   ;;  %s1122_s26 = smov [#allocation13]  }
  0x44   :  { %s73_s25 = sshll.u32 %s1121_s24, 4  ;;  %s95_s27 = sshll.u32 %s1122_s26, 4  ;;  %s74_s25 = int_to_ptr.vmem [resolvable:$true] %s73_s25  ;;  %s96_s27 = int_to_ptr.vmem [resolvable:$true] %s95_s27 }
  0x45   :  { %s1029_s28 = scalar_lea.vmem %s74_s25, 16  ;;  %s1033_s0 = scalar_lea.vmem %s74_s25, 32 }
  0x46   :  { %p1030_p2 = scmp.ne.s32.totalorder %s74_s25, %s1029_s28  ;;  %p1034_p3 = scmp.lt.s32.totalorder %s74_s25, %s74_s25 }
  0x47   :  { %p1035_p4 = scmp.lt.s32.totalorder %s1033_s0, %s1029_s28 }
  0x49   :  { %p1036_p5 = por %p1035_p4, %p1034_p3 }
  0x4b   :  { %p1037_p6 = pnand %p1036_p5, %p1030_p2 }
  0x4d   :  { %1040 = shalt.err (!%p1037_p6)
}
  0x4e   :  { %76 = dma.hbm_to_vmem [thread:$0]  %s1259_s4, 16, %s74_s25, [#allocation9]  }
  0x4f   :  { %s1049_s1 = scalar_lea.vmem %s96_s27, 16  ;;  %s1053_s2 = scalar_lea.vmem %s96_s27, 32 }
  0x50   :  { %p1050_p7 = scmp.ne.s32.totalorder %s96_s27, %s1049_s1  ;;  %p1054_p8 = scmp.lt.s32.totalorder %s96_s27, %s96_s27 }
  0x51   :  { %p1055_p9 = scmp.lt.s32.totalorder %s1053_s2, %s1049_s1 }
  0x53   :  { %p1056_p10 = por %p1055_p9, %p1054_p8 }
  0x55   :  { %p1057_p11 = pnand %p1056_p10, %p1050_p7 }
  0x57   :  { %1060 = shalt.err (!%p1057_p11)
}
  0x58   :  { %98 = dma.hbm_to_vmem [thread:$0]  %s1261_s6, 16, %s96_s27, [#allocation12]  }
  0x59   :  { %s1123_s3 = smov [#allocation16]  }
  0x5a   :  { %s117_s11 = sshll.u32 %s1123_s3, 4  ;;  %s118_s11 = int_to_ptr.vmem [resolvable:$true] %s117_s11 }
  0x5b   :  { %s1069_s12 = scalar_lea.vmem %s118_s11, 16  ;;  %s1073_s13 = scalar_lea.vmem %s118_s11, 32 }
  0x5c   :  { %p1070_p12 = scmp.ne.s32.totalorder %s118_s11, %s1069_s12  ;;  %p1074_p13 = scmp.lt.s32.totalorder %s118_s11, %s118_s11 }
  0x5d   :  { %p1075_p0 = scmp.lt.s32.totalorder %s1073_s13, %s1069_s12 }
  0x5f   :  { %p1076_p1 = por %p1075_p0, %p1074_p13 }
  0x61   :  { %p1077_p2 = pnand %p1076_p1, %p1070_p12 }
  0x63   :  { %1080 = shalt.err (!%p1077_p2)
}
  0x64   :  { %120 = dma.hbm_to_vmem [thread:$0]  %s1263_s8, 16, %s118_s11, [#allocation15]  }
  0x65   :  { %1101 = dma.done.wait [#allocation3], 256  }
  0x66   :  { %1102 = vsyncadd [#allocation3], 4294967040 }
  0x67   :  { %1103 = dma.done.wait [#allocation6], 272  }
  0x68   :  { %1104 = vsyncadd [#allocation6], 4294967024 }
  0x69   :  { %1105 = dma.done.wait [#allocation9], 272  }
  0x6a   :  { %1106 = vsyncadd [#allocation9], 4294967024 }
  0x6b   :  { %1107 = dma.done.wait [#allocation12], 272  }
  0x6c   :  { %1108 = vsyncadd [#allocation12], 4294967024 }
  0x6d   :  { %1109 = dma.done.wait [#allocation15], 272  }
  0x6e   :  { %1110 = vsyncadd [#allocation15], 4294967024  ;;  %v889_v0 = vld [vmem:[#allocation8 + $0x8] sm:$0xff]   ;;  %v890_v1 = vld [vmem:[#allocation8] sm:$0xff]   ;;  %vm188_vm0 = vcmask 261120   ;;  %vm408_vm1 = vcmask 130048  }
  0x6f   :  { %820 = vmatprep.subr.bf16.mxu1 %v889_v0  ;;  %v891_v2 = vld [vmem:[#allocation2] sm:$0xff]   ;;  %v893_v3 = vld [vmem:[#allocation5 + $0x8] sm:$0xff]   ;;  %v894_v4 = vld [vmem:[#allocation5] sm:$0xff]   ;;  %v1124_v45 = vmov 0.0   ;;  %vm1125_vm2 = vmmov 0  }
  0x70   :  { %821 = vmatpush3.bf16.msra.mxu1 %v889_v0  ;;  %824 = vmatprep.mubr.msk.bf16.mxu1 %vm188_vm0, %v891_v2  ;;  %v892_v5 = vld [vmem:[#allocation2 + $0x8] sm:$0xff]   ;;  %v895_v6 = vld [vmem:[#allocation11 + $0x8] sm:$0xff]   ;;  %v896_v7 = vld [vmem:[#allocation11] sm:$0xff]  }
  0x71   :  { %822 = vmatprep.subr.bf16.mxu1 %v890_v1  ;;  %816 = vmatprep.mubr.msk.bf16.mxu0 %vm188_vm0, %v891_v2  ;;  %v754_v12 = vld [vmem:[#allocation7] ss:$0 sm:$0xff]  ;;  %v761_v13 = vld [vmem:[#allocation10] ss:$0 sm:$0xff]  ;;  %v766_v29 = vld [vmem:[#allocation13] ss:$0 sm:$0xff] }
  0x72   :  { %812 = vmatprep.subr.bf16.mxu0 %v893_v3  ;;  %v897_v48 = vld [vmem:[%s1264_s9 + $0x8] sm:$0xff]   ;;  %v898_v54 = vld [vmem:[%s1264_s9] sm:$0xff]   ;;  %s1126_s9 = smov [#allocation17]  }
  0x73   :  { %813 = vmatpush3.bf16.msra.mxu0 %v893_v3  ;;  %v899_v0 = vld [vmem:[#allocation14 + $0x8] sm:$0xff]   ;;  %s738_s5 = sshll.u32 %s1126_s9, 4  ;;  %s739_s5 = int_to_ptr.vmem [resolvable:$true] %s738_s5 }
  0x74   :  { %823 = vmatpush3.bf16.msra.mxu1 %v890_v1  ;;  %814 = vmatprep.subr.bf16.mxu0 %v894_v4  ;;  %v900_v1 = vld [vmem:[#allocation14] sm:$0xff]   ;;  %s1081_s17 = scalar_lea.vmem %s739_s5, 512  ;;  %p1086_p4 = scmp.lt.s32.totalorder %s739_s5, %s739_s5 }
  0x75   :  { %p1082_p3 = scmp.ne.s32.totalorder %s739_s5, %s1081_s17  ;;  %p1087_p5 = scmp.lt.s32.totalorder %s1081_s17, %s1081_s17 }
  0x77   :  { %825 = vmatmul.mubr.msk.bf16.vlgmr.msra.gmra.mxu1 %vm188_vm0, %v892_v5  ;;  %815 = vmatpush3.bf16.msra.mxu0 %v894_v4  ;;  %p1088_p6 = por %p1087_p5, %p1086_p4 }
  0x78   :  { %828 = vmatprep.subr.bf16.mxu0 %v895_v6 }
  0x79   :  { %p1089_p7 = pnand %p1088_p6, %p1082_p3 }
  0x7a   :  { %817 = vmatmul.mubr.msk.bf16.vlgmr.msra.gmra.mxu0 %vm188_vm0, %v892_v5 }
  0x7b   :  { %829 = vmatpush3.bf16.msra.mxu0 %v895_v6  ;;  %832 = vmatprep.mubr.msk.bf16.mxu0 %vm188_vm0, %v891_v2 }
  0x7c   :  { %830 = vmatprep.subr.bf16.mxu0 %v896_v7 }
  0x7f   :  { %831 = vmatpush3.bf16.msra.mxu0 %v896_v7 }
  0x82   :  { %833 = vmatmul.mubr.msk.bf16.vlgmr.msra.gmra.mxu0 %vm188_vm0, %v892_v5 }
 0x137   :  { %v826_v8 = vpop.f32.mrf.mxu1 }
 0x138   :  { %v310_v27 = vadd.f32 %v826_v8, %v761_v13 }
 0x139   :  { %v301_v9 = vpop.f32.mrf.mxu1 }
 0x13a   :  { %v818_v11 = vpop.f32.mrf.mxu0  ;;  %v302_v16 = vadd.f32 %v761_v13, %v301_v9 }
 0x13b   :  { %v827_v10 = vpop.f32.mrf.mxu1  ;;  %v1232_v18 = vadd.f32 %v818_v11, %v754_v12 }
 0x13c   :  { %v229_v15 = vpop.f32.mrf.mxu0  ;;  %v313_v23 = vadd.f32 %v827_v10, %v761_v13 }
 0x13d   :  { %v304_v14 = vpop.f32.mrf.mxu1  ;;  %v230_v21 = vadd.f32 %v754_v12, %v229_v15 }
 0x13e   :  { %v305_v17 = vadd.f32 %v761_v13, %v304_v14  ;;  %v819_v19 = vpop.f32.mrf.mxu0  ;;  %v389_v31 = vpack.c.bf16 %v313_v23, %v310_v27 }
 0x13f   :  { %v1234_v22 = vadd.f32 %v819_v19, %v754_v12 }
 0x140   :  { %v388_v20 = vpack.c.bf16 %v305_v17, %v302_v16  ;;  %v232_v24 = vpop.f32.mrf.mxu0 }
 0x141   :  { %v560_v25 = vpack.c.bf16 %v1234_v22, %v1232_v18  ;;  %v233_v26 = vadd.f32 %v754_v12, %v232_v24  ;;  %v779_v12 = vld [vmem:[#allocation16] ss:$0 sm:$0xff] }
 0x142   :  { %392 = vxpose.xlu0.c.b16.start.end [1/1] (short) (narrow) %v388_v20, 32  ;;  %v834_v28 = vpop.f32.mrf.mxu0 }
 0x143   :  { %v559_v30 = vpack.c.bf16 %v233_v26, %v230_v21  ;;  %v382_v33 = vadd.f32 %v834_v28, %v766_v29 }
 0x144   :  { %v373_v32 = vpop.f32.mrf.mxu0 }
 0x145   :  { %v374_v35 = vadd.f32 %v766_v29, %v373_v32 }
 0x146   :  { %v835_v34 = vpop.f32.mrf.mxu0 }
 0x147   :  { %464 = vxpose.xlu0.c.b16.start.end [1/1] (short) (narrow) %v389_v31, 32  ;;  %v385_v36 = vadd.f32 %v835_v34, %v766_v29 }
 0x148   :  { %v376_v37 = vpop.f32.mrf.mxu0 }
 0x149   :  { %v391_v38 = vpack.c.bf16 %v385_v36, %v382_v33  ;;  %v377_v39 = vadd.f32 %v766_v29, %v376_v37 }
 0x14b   :  { %v390_v40 = vpack.c.bf16 %v377_v39, %v374_v35  ;;  %842 = vmatprep.subr.bf16.mxu0 %v391_v38 }
 0x14c   :  { %843 = vmatpush3.bf16.msra.mxu0 %v391_v38 }
 0x14d   :  { %836 = vmatprep.subr.bf16.mxu1 %v390_v40  ;;  %856 = vmatprep.subr.bf16.mxu0 %v1124_v45 }
 0x14e   :  { %837 = vmatpush3.bf16.msra.mxu1 %v390_v40 }
 0x14f   :  { %848 = vmatprep.subr.bf16.mxu1 %v1124_v45 }
 0x1a4   :  { %v400_v41 = vpop.trf.xlu0 }
 0x1a5   :  { %838 = vmatprep.mubr.msk.bf16.mxu1 %vm408_vm1, %v400_v41 }
 0x1a8   :  { %v401_v42 = vpop.trf.xlu0 }
 0x1a9   :  { %839 = vmatmul.mubr.msk.bf16.vlgmr.msra.gmra.mxu1 %vm408_vm1, %v401_v42 }
 0x1aa   :  { %852 = vmatprep.mubr.msk.bf16.mxu1 %vm1125_vm2, %v1124_v45 }
 0x1ac   :  { %v472_v43 = vpop.trf.xlu0 }
 0x1ad   :  { %844 = vmatprep.mubr.msk.bf16.mxu0 %vm408_vm1, %v472_v43 }
 0x1b0   :  { %v473_v44 = vpop.trf.xlu0 }
 0x1b1   :  { %845 = vmatmul.mubr.msk.bf16.vlgmr.msra.gmra.mxu0 %vm408_vm1, %v473_v44 }
 0x1b2   :  { %860 = vmatprep.mubr.msk.bf16.mxu0 %vm1125_vm2, %v1124_v45 }
 0x269   :  { %v840_v46 = vpop.f32.mrf.mxu1 }
 0x26b   :  { %v449_v47 = vpop.f32.mrf.mxu1 }
 0x26d   :  { %v841_v49 = vpop.f32.mrf.mxu1 }
 0x26e   :  { %v536_v50 = vpack.c.bf16 %v841_v49, %v840_v46 }
 0x26f   :  { %v452_v51 = vpop.f32.mrf.mxu1 }
 0x270   :  { %v556_v52 = vmul.bf16 %v897_v48, %v536_v50  ;;  %v535_v53 = vpack.c.bf16 %v452_v51, %v449_v47 }
 0x271   :  { %v846_v55 = vpop.f32.mrf.mxu0 }
 0x272   :  { %849 = vmatpush3.bf16.msra.mxu1 %v556_v52  ;;  %v555_v57 = vmul.bf16 %v898_v54, %v535_v53 }
 0x273   :  { %v520_v56 = vpop.f32.mrf.mxu0  ;;  %850 = vmatprep.subr.bf16.mxu1 %v1124_v45 }
 0x275   :  { %v847_v58 = vpop.f32.mrf.mxu0 }
 0x276   :  { %v538_v59 = vpack.c.bf16 %v847_v58, %v846_v55  ;;  %851 = vmatpush3.bf16.msra.mxu1 %v555_v57 }
 0x277   :  { %v523_v60 = vpop.f32.mrf.mxu0  ;;  %864 = vmatprep.subr.bf16.mxu1 %v899_v0 }
 0x278   :  { %v558_v61 = vmul.bf16 %v897_v48, %v538_v59  ;;  %v537_v62 = vpack.c.bf16 %v523_v60, %v520_v56 }
 0x279   :  { %853 = vmatmul.mubr.msk.bf16.vlgmr.msra.gmra.mxu1 %vm188_vm0, %v559_v30 }
 0x27a   :  { %857 = vmatpush3.bf16.msra.mxu0 %v558_v61  ;;  %v557_v63 = vmul.bf16 %v898_v54, %v537_v62  ;;  %865 = vmatpush3.bf16.msra.mxu1 %v899_v0 }
 0x27b   :  { %858 = vmatprep.subr.bf16.mxu0 %v1124_v45  ;;  %866 = vmatprep.subr.bf16.mxu1 %v900_v1 }
 0x27e   :  { %859 = vmatpush3.bf16.msra.mxu0 %v557_v63  ;;  %867 = vmatpush3.bf16.msra.mxu1 %v900_v1 }
 0x281   :  { %861 = vmatmul.mubr.msk.bf16.vlgmr.msra.gmra.mxu0 %vm188_vm0, %v560_v25 }
 0x339   :  { %v598_v2 = vpop.f32.mrf.mxu1 }
 0x33b   :  { %v854_v3 = vpop.f32.mrf.mxu1 }
 0x33d   :  { %v601_v4 = vpop.f32.mrf.mxu1 }
 0x33e   :  { %v649_v5 = vpack.c.bf16 %v601_v4, %v598_v2 }
 0x33f   :  { %v855_v6 = vpop.f32.mrf.mxu1 }
 0x340   :  { %868 = vmatprep.mubr.msk.bf16.mxu1 %vm188_vm0, %v649_v5 }
 0x341   :  { %v642_v7 = vpop.f32.mrf.mxu0 }
 0x343   :  { %v862_v8 = vpop.f32.mrf.mxu0 }
 0x345   :  { %v645_v9 = vpop.f32.mrf.mxu0 }
 0x346   :  { %v650_v10 = vpack.c.bf16 %v645_v9, %v642_v7 }
 0x347   :  { %v863_v11 = vpop.f32.mrf.mxu0 }
 0x348   :  { %869 = vmatmul.mubr.msk.bf16.vlgmr.msra.gmra.mxu1 %vm188_vm0, %v650_v10 }
 0x408   :  { %v870_v13 = vpop.f32.mrf.mxu1 }
 0x409   :  { %v723_v14 = vadd.f32 %v870_v13, %v779_v12 }
 0x40a   :  { %v714_v15 = vpop.f32.mrf.mxu1 }
 0x40b   :  { %731 = vst.msk [vmem:[#allocation17 + $0x10] sm:$0xff] %vm188_vm0, %v723_v14  ;;  %v715_v16 = vadd.f32 %v779_v12, %v714_v15 }
 0x40c   :  { %v871_v17 = vpop.f32.mrf.mxu1 }
 0x40d   :  { %729 = vst.msk [vmem:[#allocation17] sm:$0xff] %vm188_vm0, %v715_v16  ;;  %v726_v18 = vadd.f32 %v871_v17, %v779_v12 }
 0x40e   :  { %v717_v19 = vpop.f32.mrf.mxu1 }
 0x40f   :  { %732 = vst.msk [vmem:[#allocation17 + $0x18] sm:$0xff] %vm188_vm0, %v726_v18  ;;  %v718_v20 = vadd.f32 %v779_v12, %v717_v19 }
 0x411   :  { %730 = vst.msk [vmem:[#allocation17 + $0x8] sm:$0xff] %vm188_vm0, %v718_v20 }
 0x412   :  { %1092 = shalt.err (!%p1089_p7)
}
 0x413   :  { %s1127_s20 = smov 128   ;;  %s1128_s7 = smov 8  }
 0x414   :  { %744 = dma.vmem_to_hbm [thread:$0]  %s739_s5, 512, %s1265_s10, [#allocation4], %s1127_s20, %s1127_s20, %s1128_s7  }
 0x415   :  { %1111 = dma.done.wait [#allocation4], 512  }
 0x416   :  { %1112 = vsyncadd [#allocation4], 4294966784 }
 0x417   :  { %748 = vsyncpa [#allocation3], 1 }
 0x418   :  { %749 = vsyncpa [#allocation6], 1 }
 0x419   :  { %750 = vsyncpa [#allocation9], 1 }
 0x41a   :  { %751 = vsyncpa [#allocation12], 1 }
 0x41b   :  { %752 = vsyncpa [#allocation15], 1 }
 0x41c   :  { %753 = vsyncpa [#allocation4], 1 }

// kernel: tpu_custom_call.1
= control target key start
LH: loop header
LB: loop body
LE: loop exit
PB: predicated region body
PF: predicated region fallthrough
CT: control target
= control target key end

     0   :  { %15 = vsyncpa [#allocation3], 0  ;;  %s1255_s0 = inlined_call_operand.hbm [shape: bf16[32,32], index: 0, kind: input, shape index: {}]   ;;  %s1256_s1 = inlined_call_operand.hbm [shape: bf16[32,32], index: 1, kind: input, shape index: {}]   ;;  %s1257_s2 = inlined_call_operand.hbm [shape: f32[1,32], index: 2, kind: input, shape index: {}]   ;;  %s1258_s3 = inlined_call_operand.hbm [shape: bf16[32,32], index: 3, kind: input, shape index: {}]   ;;  %s1259_s4 = inlined_call_operand.hbm [shape: f32[1,32], index: 4, kind: input, shape index: {}]   ;;  %s1260_s5 = inlined_call_operand.hbm [shape: bf16[32,32], index: 5, kind: input, shape index: {}]   ;;  %s1261_s6 = inlined_call_operand.hbm [shape: f32[1,32], index: 6, kind: input, shape index: {}]   ;;  %s1262_s7 = inlined_call_operand.hbm [shape: bf16[32,32], index: 7, kind: input, shape index: {}]   ;;  %s1263_s8 = inlined_call_operand.hbm [shape: f32[1,32], index: 8, kind: input, shape index: {}]   ;;  %s1264_s9 = inlined_call_operand.vmem [shape: bf16[32,32], index: 9, kind: input, shape index: {}]   ;;  %s1265_s10 = inlined_call_operand.hbm [shape: f32[32,32], index: 10, kind: output, shape index: {}]  }
   0x1   :  { %16 = vsyncpa [#allocation6], 0 }
   0x2   :  { %17 = vsyncpa [#allocation9], 0 }
   0x3   :  { %18 = vsyncpa [#allocation12], 0 }
   0x4   :  { %19 = vsyncpa [#allocation15], 0 }
   0x5   :  { %20 = vsyncpa [#allocation4], 0  ;;  %s1113_s13 = smov [#allocation5]   ;;  %s1114_s15 = smov [#allocation8]  }
   0x6   :  { %s38_s14 = sshll.u32 %s1113_s13, 4  ;;  %s60_s16 = sshll.u32 %s1114_s15, 4  ;;  %s39_s14 = int_to_ptr.vmem [resolvable:$true] %s38_s14  ;;  %s61_s16 = int_to_ptr.vmem [resolvable:$true] %s60_s16 }
   0x7   :  { %s909_s17 = scalar_lea.vmem %s39_s14, 256  ;;  %p914_p1 = scmp.lt.s32.totalorder %s39_s14, %s39_s14 }
   0x8   :  { %p910_p0 = scmp.ne.s32.totalorder %s39_s14, %s909_s17  ;;  %p915_p2 = scmp.lt.s32.totalorder %s909_s17, %s909_s17 }
   0xa   :  { %p916_p3 = por %p915_p2, %p914_p1 }
   0xc   :  { %p917_p4 = pnand %p916_p3, %p910_p0 }
   0xe   :  { %920 = shalt.err (!%p917_p4)
}
   0xf   :  { %s1115_s18 = smov 64   ;;  %s1116_s19 = smov 4  }
  0x10   :  { %44 = dma.hbm_to_vmem [thread:$0]  %s1256_s1, 256, %s39_s14, [#allocation6], %s1115_s18, %s1115_s18, %s1116_s19  }
  0x11   :  { %s929_s22 = scalar_lea.vmem %s61_s16, 256  ;;  %p934_p6 = scmp.lt.s32.totalorder %s61_s16, %s61_s16 }
  0x12   :  { %p930_p5 = scmp.ne.s32.totalorder %s61_s16, %s929_s22  ;;  %p935_p7 = scmp.lt.s32.totalorder %s929_s22, %s929_s22 }
  0x14   :  { %p936_p8 = por %p935_p7, %p934_p6 }
  0x16   :  { %p937_p9 = pnand %p936_p8, %p930_p5 }
  0x18   :  { %940 = shalt.err (!%p937_p9)
}
  0x19   :  { %66 = dma.hbm_to_vmem [thread:$0]  %s1258_s3, 256, %s61_s16, [#allocation9], %s1115_s18, %s1115_s18, %s1116_s19  }
  0x1a   :  { %s1117_s25 = smov [#allocation11]   ;;  %s1118_s27 = smov [#allocation14]  }
  0x1b   :  { %s82_s26 = sshll.u32 %s1117_s25, 4  ;;  %s104_s28 = sshll.u32 %s1118_s27, 4  ;;  %s83_s26 = int_to_ptr.vmem [resolvable:$true] %s82_s26  ;;  %s105_s28 = int_to_ptr.vmem [resolvable:$true] %s104_s28 }
  0x1c   :  { %s949_s1 = scalar_lea.vmem %s83_s26, 256  ;;  %p954_p11 = scmp.lt.s32.totalorder %s83_s26, %s83_s26 }
  0x1d   :  { %p950_p10 = scmp.ne.s32.totalorder %s83_s26, %s949_s1  ;;  %p955_p12 = scmp.lt.s32.totalorder %s949_s1, %s949_s1 }
  0x1f   :  { %p956_p13 = por %p955_p12, %p954_p11 }
  0x21   :  { %p957_p0 = pnand %p956_p13, %p950_p10 }
  0x23   :  { %960 = shalt.err (!%p957_p0)
}
  0x24   :  { %88 = dma.hbm_to_vmem [thread:$0]  %s1260_s5, 256, %s83_s26, [#allocation12], %s1115_s18, %s1115_s18, %s1116_s19  }
  0x25   :  { %s969_s3 = scalar_lea.vmem %s105_s28, 256  ;;  %p974_p2 = scmp.lt.s32.totalorder %s105_s28, %s105_s28 }
  0x26   :  { %p970_p1 = scmp.ne.s32.totalorder %s105_s28, %s969_s3  ;;  %p975_p3 = scmp.lt.s32.totalorder %s969_s3, %s969_s3 }
  0x28   :  { %p976_p4 = por %p975_p3, %p974_p2 }
  0x2a   :  { %p977_p5 = pnand %p976_p4, %p970_p1 }
  0x2c   :  { %980 = shalt.err (!%p977_p5)
}
  0x2d   :  { %110 = dma.hbm_to_vmem [thread:$0]  %s1262_s7, 256, %s105_s28, [#allocation15], %s1115_s18, %s1115_s18, %s1116_s19  }
  0x2e   :  { %s1119_s13 = smov [#allocation2]   ;;  %s1120_s15 = smov [#allocation7]  }
  0x2f   :  { %s26_s14 = sshll.u32 %s1119_s13, 4  ;;  %s51_s16 = sshll.u32 %s1120_s15, 4  ;;  %s27_s14 = int_to_ptr.vmem [resolvable:$true] %s26_s14  ;;  %s52_s16 = int_to_ptr.vmem [resolvable:$true] %s51_s16 }
  0x30   :  { %s989_s5 = scalar_lea.vmem %s27_s14, 256  ;;  %p994_p7 = scmp.lt.s32.totalorder %s27_s14, %s27_s14 }
  0x31   :  { %p990_p6 = scmp.ne.s32.totalorder %s27_s14, %s989_s5  ;;  %p995_p8 = scmp.lt.s32.totalorder %s989_s5, %s989_s5 }
  0x33   :  { %p996_p9 = por %p995_p8, %p994_p7 }
  0x35   :  { %p997_p10 = pnand %p996_p9, %p990_p6 }
  0x37   :  { %1000 = shalt.err (!%p997_p10)
}
  0x38   :  { %32 = dma.hbm_to_vmem [thread:$0]  %s1255_s0, 256, %s27_s14, [#allocation3], %s1115_s18, %s1115_s18, %s1116_s19  }
  0x39   :  { %s1009_s7 = scalar_lea.vmem %s52_s16, 16  ;;  %s1013_s21 = scalar_lea.vmem %s52_s16, 32 }
  0x3a   :  { %p1010_p11 = scmp.ne.s32.totalorder %s52_s16, %s1009_s7  ;;  %p1014_p12 = scmp.lt.s32.totalorder %s52_s16, %s52_s16 }
  0x3b   :  { %p1015_p13 = scmp.lt.s32.totalorder %s1013_s21, %s1009_s7 }
  0x3d   :  { %p1016_p0 = por %p1015_p13, %p1014_p12 }
  0x3f   :  { %p1017_p1 = pnand %p1016_p0, %p1010_p11 }
  0x41   :  { %1020 = shalt.err (!%p1017_p1)
}
  0x42   :  { %54 = dma.hbm_to_vmem [thread:$0]  %s1257_s2, 16, %s52_s16, [#allocation6]  }
  0x43   :  { %s1121_s24 = smov [#allocation10]   ;;  %s1122_s26 = smov [#allocation13]  }
  0x44   :  { %s73_s25 = sshll.u32 %s1121_s24, 4  ;;  %s95_s27 = sshll.u32 %s1122_s26, 4  ;;  %s74_s25 = int_to_ptr.vmem [resolvable:$true] %s73_s25  ;;  %s96_s27 = int_to_ptr.vmem [resolvable:$true] %s95_s27 }
  0x45   :  { %s1029_s28 = scalar_lea.vmem %s74_s25, 16  ;;  %s1033_s0 = scalar_lea.vmem %s74_s25, 32 }
  0x46   :  { %p1030_p2 = scmp.ne.s32.totalorder %s74_s25, %s1029_s28  ;;  %p1034_p3 = scmp.lt.s32.totalorder %s74_s25, %s74_s25 }
  0x47   :  { %p1035_p4 = scmp.lt.s32.totalorder %s1033_s0, %s1029_s28 }
  0x49   :  { %p1036_p5 = por %p1035_p4, %p1034_p3 }
  0x4b   :  { %p1037_p6 = pnand %p1036_p5, %p1030_p2 }
  0x4d   :  { %1040 = shalt.err (!%p1037_p6)
}
  0x4e   :  { %76 = dma.hbm_to_vmem [thread:$0]  %s1259_s4, 16, %s74_s25, [#allocation9]  }
  0x4f   :  { %s1049_s1 = scalar_lea.vmem %s96_s27, 16  ;;  %s1053_s2 = scalar_lea.vmem %s96_s27, 32 }
  0x50   :  { %p1050_p7 = scmp.ne.s32.totalorder %s96_s27, %s1049_s1  ;;  %p1054_p8 = scmp.lt.s32.totalorder %s96_s27, %s96_s27 }
  0x51   :  { %p1055_p9 = scmp.lt.s32.totalorder %s1053_s2, %s1049_s1 }
  0x53   :  { %p1056_p10 = por %p1055_p9, %p1054_p8 }
  0x55   :  { %p1057_p11 = pnand %p1056_p10, %p1050_p7 }
  0x57   :  { %1060 = shalt.err (!%p1057_p11)
}
  0x58   :  { %98 = dma.hbm_to_vmem [thread:$0]  %s1261_s6, 16, %s96_s27, [#allocation12]  }
  0x59   :  { %s1123_s3 = smov [#allocation16]  }
  0x5a   :  { %s117_s11 = sshll.u32 %s1123_s3, 4  ;;  %s118_s11 = int_to_ptr.vmem [resolvable:$true] %s117_s11 }
  0x5b   :  { %s1069_s12 = scalar_lea.vmem %s118_s11, 16  ;;  %s1073_s13 = scalar_lea.vmem %s118_s11, 32 }
  0x5c   :  { %p1070_p12 = scmp.ne.s32.totalorder %s118_s11, %s1069_s12  ;;  %p1074_p13 = scmp.lt.s32.totalorder %s118_s11, %s118_s11 }
  0x5d   :  { %p1075_p0 = scmp.lt.s32.totalorder %s1073_s13, %s1069_s12 }
  0x5f   :  { %p1076_p1 = por %p1075_p0, %p1074_p13 }
  0x61   :  { %p1077_p2 = pnand %p1076_p1, %p1070_p12 }
  0x63   :  { %1080 = shalt.err (!%p1077_p2)
}
  0x64   :  { %120 = dma.hbm_to_vmem [thread:$0]  %s1263_s8, 16, %s118_s11, [#allocation15]  }
  0x65   :  { %1101 = dma.done.wait [#allocation3], 256  }
  0x66   :  { %1102 = vsyncadd [#allocation3], 4294967040 }
  0x67   :  { %1103 = dma.done.wait [#allocation6], 272  }
  0x68   :  { %1104 = vsyncadd [#allocation6], 4294967024 }
  0x69   :  { %1105 = dma.done.wait [#allocation9], 272  }
  0x6a   :  { %1106 = vsyncadd [#allocation9], 4294967024 }
  0x6b   :  { %1107 = dma.done.wait [#allocation12], 272  }
  0x6c   :  { %1108 = vsyncadd [#allocation12], 4294967024 }
  0x6d   :  { %1109 = dma.done.wait [#allocation15], 272  }
  0x6e   :  { %1110 = vsyncadd [#allocation15], 4294967024  ;;  %v889_v0 = vld [vmem:[#allocation8 + $0x8] sm:$0xff]   ;;  %v890_v1 = vld [vmem:[#allocation8] sm:$0xff]   ;;  %vm188_vm0 = vcmask 261120   ;;  %vm408_vm1 = vcmask 130048  }
  0x6f   :  { %820 = vmatprep.subr.bf16.mxu1 %v889_v0  ;;  %v891_v2 = vld [vmem:[#allocation2] sm:$0xff]   ;;  %v893_v3 = vld [vmem:[#allocation5 + $0x8] sm:$0xff]   ;;  %v894_v4 = vld [vmem:[#allocation5] sm:$0xff]   ;;  %v1124_v45 = vmov 0.0   ;;  %vm1125_vm2 = vmmov 0  }
  0x70   :  { %821 = vmatpush3.bf16.msra.mxu1 %v889_v0  ;;  %824 = vmatprep.mubr.msk.bf16.mxu1 %vm188_vm0, %v891_v2  ;;  %v892_v5 = vld [vmem:[#allocation2 + $0x8] sm:$0xff]   ;;  %v895_v6 = vld [vmem:[#allocation11 + $0x8] sm:$0xff]   ;;  %v896_v7 = vld [vmem:[#allocation11] sm:$0xff]  }
  0x71   :  { %822 = vmatprep.subr.bf16.mxu1 %v890_v1  ;;  %816 = vmatprep.mubr.msk.bf16.mxu0 %vm188_vm0, %v891_v2  ;;  %v754_v12 = vld [vmem:[#allocation7] ss:$0 sm:$0xff]  ;;  %v761_v13 = vld [vmem:[#allocation10] ss:$0 sm:$0xff]  ;;  %v766_v29 = vld [vmem:[#allocation13] ss:$0 sm:$0xff] }
  0x72   :  { %812 = vmatprep.subr.bf16.mxu0 %v893_v3  ;;  %v897_v48 = vld [vmem:[%s1264_s9 + $0x8] sm:$0xff]   ;;  %v898_v54 = vld [vmem:[%s1264_s9] sm:$0xff]   ;;  %s1126_s9 = smov [#allocation17]  }
  0x73   :  { %813 = vmatpush3.bf16.msra.mxu0 %v893_v3  ;;  %v899_v0 = vld [vmem:[#allocation14 + $0x8] sm:$0xff]   ;;  %s738_s5 = sshll.u32 %s1126_s9, 4  ;;  %s739_s5 = int_to_ptr.vmem [resolvable:$true] %s738_s5 }
  0x74   :  { %823 = vmatpush3.bf16.msra.mxu1 %v890_v1  ;;  %814 = vmatprep.subr.bf16.mxu0 %v894_v4  ;;  %v900_v1 = vld [vmem:[#allocation14] sm:$0xff]   ;;  %s1081_s17 = scalar_lea.vmem %s739_s5, 512  ;;  %p1086_p4 = scmp.lt.s32.totalorder %s739_s5, %s739_s5 }
  0x75   :  { %p1082_p3 = scmp.ne.s32.totalorder %s739_s5, %s1081_s17  ;;  %p1087_p5 = scmp.lt.s32.totalorder %s1081_s17, %s1081_s17 }
  0x77   :  { %825 = vmatmul.mubr.msk.bf16.vlgmr.msra.gmra.mxu1 %vm188_vm0, %v892_v5  ;;  %815 = vmatpush3.bf16.msra.mxu0 %v894_v4  ;;  %p1088_p6 = por %p1087_p5, %p1086_p4 }
  0x78   :  { %828 = vmatprep.subr.bf16.mxu0 %v895_v6 }
  0x79   :  { %p1089_p7 = pnand %p1088_p6, %p1082_p3 }
  0x7a   :  { %817 = vmatmul.mubr.msk.bf16.vlgmr.msra.gmra.mxu0 %vm188_vm0, %v892_v5 }
  0x7b   :  { %829 = vmatpush3.bf16.msra.mxu0 %v895_v6  ;;  %832 = vmatprep.mubr.msk.bf16.mxu0 %vm188_vm0, %v891_v2 }
  0x7c   :  { %830 = vmatprep.subr.bf16.mxu0 %v896_v7 }
  0x7f   :  { %831 = vmatpush3.bf16.msra.mxu0 %v896_v7 }
  0x82   :  { %833 = vmatmul.mubr.msk.bf16.vlgmr.msra.gmra.mxu0 %vm188_vm0, %v892_v5 }
 0x137   :  { %v826_v8 = vpop.f32.mrf.mxu1 }
 0x138   :  { %v310_v27 = vadd.f32 %v826_v8, %v761_v13 }
 0x139   :  { %v301_v9 = vpop.f32.mrf.mxu1 }
 0x13a   :  { %v818_v11 = vpop.f32.mrf.mxu0  ;;  %v302_v16 = vadd.f32 %v761_v13, %v301_v9 }
 0x13b   :  { %v827_v10 = vpop.f32.mrf.mxu1  ;;  %v1232_v18 = vadd.f32 %v818_v11, %v754_v12 }
 0x13c   :  { %v229_v15 = vpop.f32.mrf.mxu0  ;;  %v313_v23 = vadd.f32 %v827_v10, %v761_v13 }
 0x13d   :  { %v304_v14 = vpop.f32.mrf.mxu1  ;;  %v230_v21 = vadd.f32 %v754_v12, %v229_v15 }
 0x13e   :  { %v305_v17 = vadd.f32 %v761_v13, %v304_v14  ;;  %v819_v19 = vpop.f32.mrf.mxu0  ;;  %v389_v31 = vpack.c.bf16 %v313_v23, %v310_v27 }
 0x13f   :  { %v1234_v22 = vadd.f32 %v819_v19, %v754_v12 }
 0x140   :  { %v388_v20 = vpack.c.bf16 %v305_v17, %v302_v16  ;;  %v232_v24 = vpop.f32.mrf.mxu0 }
 0x141   :  { %v560_v25 = vpack.c.bf16 %v1234_v22, %v1232_v18  ;;  %v233_v26 = vadd.f32 %v754_v12, %v232_v24  ;;  %v779_v12 = vld [vmem:[#allocation16] ss:$0 sm:$0xff] }
 0x142   :  { %392 = vxpose.xlu0.c.b16.start.end [1/1] (short) (narrow) %v388_v20, 32  ;;  %v834_v28 = vpop.f32.mrf.mxu0 }
 0x143   :  { %v559_v30 = vpack.c.bf16 %v233_v26, %v230_v21  ;;  %v382_v33 = vadd.f32 %v834_v28, %v766_v29 }
 0x144   :  { %v373_v32 = vpop.f32.mrf.mxu0 }
 0x145   :  { %v374_v35 = vadd.f32 %v766_v29, %v373_v32 }
 0x146   :  { %v835_v34 = vpop.f32.mrf.mxu0 }
 0x147   :  { %464 = vxpose.xlu0.c.b16.start.end [1/1] (short) (narrow) %v389_v31, 32  ;;  %v385_v36 = vadd.f32 %v835_v34, %v766_v29 }
 0x148   :  { %v376_v37 = vpop.f32.mrf.mxu0 }
 0x149   :  { %v391_v38 = vpack.c.bf16 %v385_v36, %v382_v33  ;;  %v377_v39 = vadd.f32 %v766_v29, %v376_v37 }
 0x14b   :  { %v390_v40 = vpack.c.bf16 %v377_v39, %v374_v35  ;;  %842 = vmatprep.subr.bf16.mxu0 %v391_v38 }
 0x14c   :  { %843 = vmatpush3.bf16.msra.mxu0 %v391_v38 }
 0x14d   :  { %836 = vmatprep.subr.bf16.mxu1 %v390_v40  ;;  %856 = vmatprep.subr.bf16.mxu0 %v1124_v45 }
 0x14e   :  { %837 = vmatpush3.bf16.msra.mxu1 %v390_v40 }
 0x14f   :  { %848 = vmatprep.subr.bf16.mxu1 %v1124_v45 }
 0x1a4   :  { %v400_v41 = vpop.trf.xlu0 }
 0x1a5   :  { %838 = vmatprep.mubr.msk.bf16.mxu1 %vm408_vm1, %v400_v41 }
 0x1a8   :  { %v401_v42 = vpop.trf.xlu0 }
 0x1a9   :  { %839 = vmatmul.mubr.msk.bf16.vlgmr.msra.gmra.mxu1 %vm408_vm1, %v401_v42 }
 0x1aa   :  { %852 = vmatprep.mubr.msk.bf16.mxu1 %vm1125_vm2, %v1124_v45 }
 0x1ac   :  { %v472_v43 = vpop.trf.xlu0 }
 0x1ad   :  { %844 = vmatprep.mubr.msk.bf16.mxu0 %vm408_vm1, %v472_v43 }
 0x1b0   :  { %v473_v44 = vpop.trf.xlu0 }
 0x1b1   :  { %845 = vmatmul.mubr.msk.bf16.vlgmr.msra.gmra.mxu0 %vm408_vm1, %v473_v44 }
 0x1b2   :  { %860 = vmatprep.mubr.msk.bf16.mxu0 %vm1125_vm2, %v1124_v45 }
 0x269   :  { %v840_v46 = vpop.f32.mrf.mxu1 }
 0x26b   :  { %v449_v47 = vpop.f32.mrf.mxu1 }
 0x26d   :  { %v841_v49 = vpop.f32.mrf.mxu1 }
 0x26e   :  { %v536_v50 = vpack.c.bf16 %v841_v49, %v840_v46 }
 0x26f   :  { %v452_v51 = vpop.f32.mrf.mxu1 }
 0x270   :  { %v556_v52 = vmul.bf16 %v897_v48, %v536_v50  ;;  %v535_v53 = vpack.c.bf16 %v452_v51, %v449_v47 }
 0x271   :  { %v846_v55 = vpop.f32.mrf.mxu0 }
 0x272   :  { %849 = vmatpush3.bf16.msra.mxu1 %v556_v52  ;;  %v555_v57 = vmul.bf16 %v898_v54, %v535_v53 }
 0x273   :  { %v520_v56 = vpop.f32.mrf.mxu0  ;;  %850 = vmatprep.subr.bf16.mxu1 %v1124_v45 }
 0x275   :  { %v847_v58 = vpop.f32.mrf.mxu0 }
 0x276   :  { %v538_v59 = vpack.c.bf16 %v847_v58, %v846_v55  ;;  %851 = vmatpush3.bf16.msra.mxu1 %v555_v57 }
 0x277   :  { %v523_v60 = vpop.f32.mrf.mxu0  ;;  %864 = vmatprep.subr.bf16.mxu1 %v899_v0 }
 0x278   :  { %v558_v61 = vmul.bf16 %v897_v48, %v538_v59  ;;  %v537_v62 = vpack.c.bf16 %v523_v60, %v520_v56 }
 0x279   :  { %853 = vmatmul.mubr.msk.bf16.vlgmr.msra.gmra.mxu1 %vm188_vm0, %v559_v30 }
 0x27a   :  { %857 = vmatpush3.bf16.msra.mxu0 %v558_v61  ;;  %v557_v63 = vmul.bf16 %v898_v54, %v537_v62  ;;  %865 = vmatpush3.bf16.msra.mxu1 %v899_v0 }
 0x27b   :  { %858 = vmatprep.subr.bf16.mxu0 %v1124_v45  ;;  %866 = vmatprep.subr.bf16.mxu1 %v900_v1 }
 0x27e   :  { %859 = vmatpush3.bf16.msra.mxu0 %v557_v63  ;;  %867 = vmatpush3.bf16.msra.mxu1 %v900_v1 }
 0x281   :  { %861 = vmatmul.mubr.msk.bf16.vlgmr.msra.gmra.mxu0 %vm188_vm0, %v560_v25 }
 0x339   :  { %v598_v2 = vpop.f32.mrf.mxu1 }
 0x33b   :  { %v854_v3 = vpop.f32.mrf.mxu1 }
 0x33d   :  { %v601_v4 = vpop.f32.mrf.mxu1 }
 0x33e   :  { %v649_v5 = vpack.c.bf16 %v601_v4, %v598_v2 }
 0x33f   :  { %v855_v6 = vpop.f32.mrf.mxu1 }
 0x340   :  { %868 = vmatprep.mubr.msk.bf16.mxu1 %vm188_vm0, %v649_v5 }
 0x341   :  { %v642_v7 = vpop.f32.mrf.mxu0 }
 0x343   :  { %v862_v8 = vpop.f32.mrf.mxu0 }
 0x345   :  { %v645_v9 = vpop.f32.mrf.mxu0 }
 0x346   :  { %v650_v10 = vpack.c.bf16 %v645_v9, %v642_v7 }
 0x347   :  { %v863_v11 = vpop.f32.mrf.mxu0 }
 0x348   :  { %869 = vmatmul.mubr.msk.bf16.vlgmr.msra.gmra.mxu1 %vm188_vm0, %v650_v10 }
 0x408   :  { %v870_v13 = vpop.f32.mrf.mxu1 }
 0x409   :  { %v723_v14 = vadd.f32 %v870_v13, %v779_v12 }
 0x40a   :  { %v714_v15 = vpop.f32.mrf.mxu1 }
 0x40b   :  { %731 = vst.msk [vmem:[#allocation17 + $0x10] sm:$0xff] %vm188_vm0, %v723_v14  ;;  %v715_v16 = vadd.f32 %v779_v12, %v714_v15 }
 0x40c   :  { %v871_v17 = vpop.f32.mrf.mxu1 }
 0x40d   :  { %729 = vst.msk [vmem:[#allocation17] sm:$0xff] %vm188_vm0, %v715_v16  ;;  %v726_v18 = vadd.f32 %v871_v17, %v779_v12 }
 0x40e   :  { %v717_v19 = vpop.f32.mrf.mxu1 }
 0x40f   :  { %732 = vst.msk [vmem:[#allocation17 + $0x18] sm:$0xff] %vm188_vm0, %v726_v18  ;;  %v718_v20 = vadd.f32 %v779_v12, %v717_v19 }
 0x411   :  { %730 = vst.msk [vmem:[#allocation17 + $0x8] sm:$0xff] %vm188_vm0, %v718_v20 }
 0x412   :  { %1092 = shalt.err (!%p1089_p7)
}
 0x413   :  { %s1127_s20 = smov 128   ;;  %s1128_s7 = smov 8  }
 0x414   :  { %744 = dma.vmem_to_hbm [thread:$0]  %s739_s5, 512, %s1265_s10, [#allocation4], %s1127_s20, %s1127_s20, %s1128_s7  }
 0x415   :  { %1111 = dma.done.wait [#allocation4], 512  }
 0x416   :  { %1112 = vsyncadd [#allocation4], 4294966784 }
 0x417   :  { %748 = vsyncpa [#allocation3], 1 }
 0x418   :  { %749 = vsyncpa [#allocation6], 1 }
 0x419   :  { %750 = vsyncpa [#allocation9], 1 }
 0x41a   :  { %751 = vsyncpa [#allocation12], 1 }
 0x41b   :  { %752 = vsyncpa [#allocation15], 1 }
 0x41c   :  { %753 = vsyncpa [#allocation4], 1 }

</bundles_post_ra>
